<compile_context>
chip_gen: v5e
topology: v5e:2x2
jax: 0.10.0
libtpu: 0.0.40
codegen_flags: <defaults>
</compile_context>

<pallas_src>
import math

import jax
import jax.numpy as jnp
from jax.experimental import pallas as pl
from jax.experimental.pallas import tpu as pltpu

NEG_SLOPE = 0.01
PAD = 128  # lane-padded width for hidden / action feature dims


def _lrelu(x):
    return jnp.where(x >= 0, x, NEG_SLOPE * x)


def actor_kernel(x_ref, w1_ref, w2_ref, wa_ref, bias_ref, out_ref):
    # bias slab rows: 0 -> b1, 1 -> b2, 2 -> ba (all lane-padded with zeros)
    b1 = bias_ref[0:1, :]
    b2 = bias_ref[1:2, :]
    ba = bias_ref[2:3, :]

    x = x_ref[...]                                                     # (TB, D_pad)

    h = jnp.dot(x, w1_ref[...], preferred_element_type=jnp.float32) + b1
    h = _lrelu(h)                                                      # (TB, 128)

    h = jnp.dot(h, w2_ref[...], preferred_element_type=jnp.float32) + b2
    h = _lrelu(h)                                                      # (TB, 128)

    p = jnp.dot(h, wa_ref[...], preferred_element_type=jnp.float32) + ba
    out_ref[...] = jnp.tanh(p)                                         # (TB, 128)


def _round_up(n, m):
    return ((n + m - 1) // m) * m


def actor_forward(x, params, action_size):
    """x: (B, num_inputs) float32 -> policy: (B, action_size) float32."""
    x = x.astype(jnp.float32)
    B, D = x.shape
    D_pad = params["w1"].shape[0]          # input dim already lane-padded at init

    # pad activations once so every kernel operand is lane/sublane aligned
    TB = min(_round_up(B, 8), 256)         # batch tile (sublane aligned)
    B_pad = _round_up(B, TB)
    if B_pad != B or D_pad != D:
        x = jnp.pad(x, ((0, B_pad - B), (0, D_pad - D)))
    grid = (B_pad // TB,)

    out = pl.pallas_call(
        actor_kernel,
        out_shape=jax.ShapeDtypeStruct((B_pad, PAD), jnp.float32),
        grid=grid,
        in_specs=[
            pl.BlockSpec((TB, D_pad), lambda i: (i, 0)),    # x tile (lane-dense)
            pl.BlockSpec((D_pad, PAD), lambda i: (0, 0)),   # W1 (padded)
            pl.BlockSpec((PAD, PAD), lambda i: (0, 0)),     # W2 (padded)
            pl.BlockSpec((PAD, PAD), lambda i: (0, 0)),     # Wa (padded)
            pl.BlockSpec((8, PAD), lambda i: (0, 0)),       # packed biases
        ],
        out_specs=pl.BlockSpec((TB, PAD), lambda i: (i, 0)),
        compiler_params=pltpu.CompilerParams(
            dimension_semantics=("parallel",),
            vmem_limit_bytes=32 * 1024 * 1024,
        ),
    )(x, params["w1"], params["w2"], params["wa"], params["bias"])

    # lane-dense slab -> user-facing shape
    return out[:B, :action_size]


def init_params(key, num_inputs, num_units_1, num_units_2, action_size):
    """Mimics nn.Linear default init followed by actor_agent.reset_parameters()."""
    gain = math.sqrt(2.0 / (1.0 + NEG_SLOPE ** 2))   # calculate_gain('leaky_relu')
    gain_tanh = 5.0 / 3.0                            # calculate_gain('tanh')
    k1, k2, k3, k4, k5, k6 = jax.random.split(key, 6)

    def linear(kw, kb, fan_in, fan_out, g):
        bound = 1.0 / math.sqrt(fan_in)
        w = jax.random.uniform(kw, (fan_in, fan_out), jnp.float32, -bound, bound) * g
        b = jax.random.uniform(kb, (fan_out,), jnp.float32, -bound, bound)
        return w, b

    w1, b1 = linear(k1, k2, num_inputs, num_units_1, gain)
    w2, b2 = linear(k3, k4, num_units_1, num_units_2, gain)
    wa, ba = linear(k5, k6, num_units_2, action_size, gain_tanh)

    d_pad = _round_up(num_inputs, PAD)

    def pad_to(w, rows, cols):
        return jnp.pad(w, ((0, rows - w.shape[0]), (0, cols - w.shape[1])))

    # Zero-padding keeps the math exact: padded input cols hit zero weight rows,
    # padded hidden cols are LReLU(0)=0 feeding zero rows, padded action cols
    # are tanh(0)=0 and get sliced off in the wrapper.
    packed = {
        "w1": pad_to(w1, d_pad, PAD),
        "w2": pad_to(w2, PAD, PAD),
        "wa": pad_to(wa, PAD, PAD),
        "bias": jnp.zeros((8, PAD), jnp.float32)
        .at[0, :num_units_1].set(b1)
        .at[1, :num_units_2].set(b2)
        .at[2, :action_size].set(ba),
    }
    raw = {"w1": w1, "b1": b1, "w2": w2, "b2": b2, "wa": wa, "ba": ba}
    return packed, raw


def _reference(x, raw):
    h = jnp.dot(x, raw["w1"]) + raw["b1"]
    h = jnp.where(h >= 0, h, NEG_SLOPE * h)
    h = jnp.dot(h, raw["w2"]) + raw["b2"]
    h = jnp.where(h >= 0, h, NEG_SLOPE * h)
    return jnp.tanh(jnp.dot(h, raw["wa"]) + raw["ba"])


if __name__ == "__main__":
    key = jax.random.PRNGKey(0)
    kp, kx = jax.random.split(key)

    B = 8
    NUM_INPUTS = 48
    NUM_UNITS_1 = 64
    NUM_UNITS_2 = 64
    ACTION_SIZE = 5

    packed, raw = init_params(kp, NUM_INPUTS, NUM_UNITS_1, NUM_UNITS_2, ACTION_SIZE)
    obs = jax.random.normal(kx, (B, NUM_INPUTS), jnp.float32)

    policy = actor_forward(obs, packed, ACTION_SIZE)
    jax.block_until_ready(policy)

    ref = _reference(obs, raw)
    assert policy.shape == (B, ACTION_SIZE)
    assert jnp.allclose(policy, ref, atol=1e-4, rtol=1e-4)

    print("KERNEL_OK")
</pallas_src>

<mosaic_0001>
module attributes {stable_mosaic.version = 11 : i64} {
  func.func @actor_kernel(%arg0: i32, %arg1: memref<8x128xf32, #tpu.memory_space<vmem>>, %arg2: memref<128x128xf32, #tpu.memory_space<vmem>>, %arg3: memref<128x128xf32, #tpu.memory_space<vmem>>, %arg4: memref<128x128xf32, #tpu.memory_space<vmem>>, %arg5: memref<8x128xf32, #tpu.memory_space<vmem>>, %arg6: memref<8x128xf32, #tpu.memory_space<vmem>>) attributes {dimension_semantics = [#tpu.dimension_semantics<parallel>], iteration_bounds = array<i64: 1>, scalar_prefetch = 0 : i64, scratch_operands = 0 : i64, tpu.core_type = #tpu.core_type<tc>, window_params = [{transform_indices = @transform_0, window_bounds = array<i64: 8, 128>}, {pipeline_mode = #tpu.pipeline_mode<synchronous>, transform_indices = @transform_1, window_bounds = array<i64: 128, 128>}, {pipeline_mode = #tpu.pipeline_mode<synchronous>, transform_indices = @transform_2, window_bounds = array<i64: 128, 128>}, {pipeline_mode = #tpu.pipeline_mode<synchronous>, transform_indices = @transform_3, window_bounds = array<i64: 128, 128>}, {pipeline_mode = #tpu.pipeline_mode<synchronous>, transform_indices = @transform_4, window_bounds = array<i64: 8, 128>}, {transform_indices = @transform_5, window_bounds = array<i64: 8, 128>}]} {
    %c0 = arith.constant 0 : index
    %c0_0 = arith.constant 0 : index
    %0 = vector.load %arg5[%c0, %c0_0] : memref<8x128xf32, #tpu.memory_space<vmem>>, vector<1x128xf32>
    %c1 = arith.constant 1 : index
    %c0_1 = arith.constant 0 : index
    %1 = vector.load %arg5[%c1, %c0_1] : memref<8x128xf32, #tpu.memory_space<vmem>>, vector<1x128xf32>
    %c2 = arith.constant 2 : index
    %c0_2 = arith.constant 0 : index
    %2 = vector.load %arg5[%c2, %c0_2] : memref<8x128xf32, #tpu.memory_space<vmem>>, vector<1x128xf32>
    %c0_3 = arith.constant 0 : index
    %c0_4 = arith.constant 0 : index
    %3 = vector.load %arg1[%c0_3, %c0_4] : memref<8x128xf32, #tpu.memory_space<vmem>>, vector<8x128xf32>
    %c0_5 = arith.constant 0 : index
    %c0_6 = arith.constant 0 : index
    %4 = vector.load %arg2[%c0_5, %c0_6] : memref<128x128xf32, #tpu.memory_space<vmem>>, vector<128x128xf32>
    %cst = arith.constant dense<0.000000e+00> : vector<8x128xf32>
    %5 = tpu.matmul %3, %4, %cst {dimension_numbers = #tpu.dot_dimension_numbers<[1], [0], [0], [1], [0, 0, 1, 1], [], []>} : vector<8x128xf32>, vector<128x128xf32>, vector<8x128xf32> -> vector<8x128xf32>
    %6 = vector.broadcast %0 : vector<1x128xf32> to vector<8x128xf32>
    %7 = arith.addf %5, %6 : vector<8x128xf32>
    %cst_7 = arith.constant 0.000000e+00 : f32
    %8 = vector.broadcast %cst_7 : f32 to vector<8x128xf32>
    %9 = arith.cmpf oge, %7, %8 : vector<8x128xf32>
    %cst_8 = arith.constant 0.00999999977 : f32
    %10 = vector.broadcast %cst_8 : f32 to vector<8x128xf32>
    %11 = arith.mulf %10, %7 : vector<8x128xf32>
    %12 = arith.select %9, %7, %11 : vector<8x128xi1>, vector<8x128xf32>
    %c0_9 = arith.constant 0 : index
    %c0_10 = arith.constant 0 : index
    %13 = vector.load %arg3[%c0_9, %c0_10] : memref<128x128xf32, #tpu.memory_space<vmem>>, vector<128x128xf32>
    %cst_11 = arith.constant dense<0.000000e+00> : vector<8x128xf32>
    %14 = tpu.matmul %12, %13, %cst_11 {dimension_numbers = #tpu.dot_dimension_numbers<[1], [0], [0], [1], [0, 0, 1, 1], [], []>} : vector<8x128xf32>, vector<128x128xf32>, vector<8x128xf32> -> vector<8x128xf32>
    %15 = vector.broadcast %1 : vector<1x128xf32> to vector<8x128xf32>
    %16 = arith.addf %14, %15 : vector<8x128xf32>
    %cst_12 = arith.constant 0.000000e+00 : f32
    %17 = vector.broadcast %cst_12 : f32 to vector<8x128xf32>
    %18 = arith.cmpf oge, %16, %17 : vector<8x128xf32>
    %cst_13 = arith.constant 0.00999999977 : f32
    %19 = vector.broadcast %cst_13 : f32 to vector<8x128xf32>
    %20 = arith.mulf %19, %16 : vector<8x128xf32>
    %21 = arith.select %18, %16, %20 : vector<8x128xi1>, vector<8x128xf32>
    %c0_14 = arith.constant 0 : index
    %c0_15 = arith.constant 0 : index
    %22 = vector.load %arg4[%c0_14, %c0_15] : memref<128x128xf32, #tpu.memory_space<vmem>>, vector<128x128xf32>
    %cst_16 = arith.constant dense<0.000000e+00> : vector<8x128xf32>
    %23 = tpu.matmul %21, %22, %cst_16 {dimension_numbers = #tpu.dot_dimension_numbers<[1], [0], [0], [1], [0, 0, 1, 1], [], []>} : vector<8x128xf32>, vector<128x128xf32>, vector<8x128xf32> -> vector<8x128xf32>
    %24 = vector.broadcast %2 : vector<1x128xf32> to vector<8x128xf32>
    %25 = arith.addf %23, %24 : vector<8x128xf32>
    %26 = math.tanh %25 : vector<8x128xf32>
    %c0_17 = arith.constant 0 : index
    %c0_18 = arith.constant 0 : index
    %27 = vector.load %arg6[%c0_17, %c0_18] : memref<8x128xf32, #tpu.memory_space<vmem>>, vector<8x128xf32>
    tpu.vector_store %arg6[%c0_17, %c0_18], %26 {strides = array<i32>} : memref<8x128xf32, #tpu.memory_space<vmem>>, vector<8x128xf32>,
    return
  }
  func.func @transform_0(%arg0: i32) -> (i32, i32) {
    %c0_i32 = arith.constant 0 : i32
    %c0_i32_0 = arith.constant 0 : i32
    return %arg0, %c0_i32 : i32, i32
  }
  func.func @transform_1(%arg0: i32) -> (i32, i32) {
    %c0_i32 = arith.constant 0 : i32
    %c0_i32_0 = arith.constant 0 : i32
    %c0_i32_1 = arith.constant 0 : i32
    return %c0_i32, %c0_i32_0 : i32, i32
  }
  func.func @transform_2(%arg0: i32) -> (i32, i32) {
    %c0_i32 = arith.constant 0 : i32
    %c0_i32_0 = arith.constant 0 : i32
    %c0_i32_1 = arith.constant 0 : i32
    return %c0_i32, %c0_i32_0 : i32, i32
  }
  func.func @transform_3(%arg0: i32) -> (i32, i32) {
    %c0_i32 = arith.constant 0 : i32
    %c0_i32_0 = arith.constant 0 : i32
    %c0_i32_1 = arith.constant 0 : i32
    return %c0_i32, %c0_i32_0 : i32, i32
  }
  func.func @transform_4(%arg0: i32) -> (i32, i32) {
    %c0_i32 = arith.constant 0 : i32
    %c0_i32_0 = arith.constant 0 : i32
    %c0_i32_1 = arith.constant 0 : i32
    return %c0_i32, %c0_i32_0 : i32, i32
  }
  func.func @transform_5(%arg0: i32) -> (i32, i32) {
    %c0_i32 = arith.constant 0 : i32
    %c0_i32_0 = arith.constant 0 : i32
    return %arg0, %c0_i32 : i32, i32
  }
}

</mosaic_0001>

<bundles_post_ra>
// kernel: tpu_custom_call.1
= control target key start
LH: loop header
LB: loop body
LE: loop exit
PB: predicated region body
PF: predicated region fallthrough
CT: control target
= control target key end

     0   :  { %10 = vsyncpa [#allocation3], 0  ;;  %s458_s0 = inlined_call_operand.hbm [shape: f32[8,128], index: 0, kind: input, shape index: {}]   ;;  %s459_s1 = inlined_call_operand.hbm [shape: f32[128,128], index: 1, kind: input, shape index: {}]   ;;  %s460_s2 = inlined_call_operand.hbm [shape: f32[128,128], index: 2, kind: input, shape index: {}]   ;;  %s461_s3 = inlined_call_operand.hbm [shape: f32[128,128], index: 3, kind: input, shape index: {}]   ;;  %s462_s4 = inlined_call_operand.hbm [shape: f32[8,128], index: 4, kind: input, shape index: {}]   ;;  %s463_s5 = inlined_call_operand.hbm [shape: f32[8,128], index: 5, kind: output, shape index: {}]  }
   0x1   :  { %11 = vsyncpa [#allocation6], 0 }
   0x2   :  { %12 = vsyncpa [#allocation9], 0  ;;  %s29_s20 = sshll.u32 %s459_s1, 4  ;;  %s30_s20 = int_to_ptr.hbm [resolvable:$true] %s29_s20 }
   0x3   :  { %13 = vsyncpa [#allocation4], 0  ;;  %s402_s21 = smov [#allocation5]   ;;  %s55_s25 = sshll.u32 %s461_s3, 4  ;;  %s56_s25 = int_to_ptr.hbm [resolvable:$true] %s55_s25 }
   0x4   :  { %s31_s22 = sshll.u32 %s402_s21, 4  ;;  %s403_s26 = smov 128   ;;  %s32_s22 = int_to_ptr.vmem [resolvable:$true] %s31_s22 }
   0x5   :  { %s404_s27 = smov 8   ;;  %s405_s28 = smov [#allocation8]  }
   0x6   :  { %37 = dma.hbm_to_vmem [thread:$0]  %s30_s20, 2048, %s32_s22, [#allocation6], %s403_s26, %s403_s26, %s404_s27  }
   0x7   :  { %s57_s29 = sshll.u32 %s405_s28, 4  ;;  %s19_s7 = sshll.u32 %s458_s0, 4  ;;  %s58_s29 = int_to_ptr.vmem [resolvable:$true] %s57_s29  ;;  %s20_s7 = int_to_ptr.hbm [resolvable:$true] %s19_s7 }
   0x8   :  { %63 = dma.hbm_to_vmem [thread:$0]  %s56_s25, 2048, %s58_s29, [#allocation9], %s403_s26, %s403_s26, %s404_s27  }
   0x9   :  { %s42_s9 = sshll.u32 %s460_s2, 4  ;;  %s406_s10 = smov [#allocation2]   ;;  %s43_s9 = int_to_ptr.hbm [resolvable:$true] %s42_s9 }
   0xa   :  { %s21_s11 = sshll.u32 %s406_s10, 4  ;;  %s407_s3 = smov [#allocation7]   ;;  %s22_s11 = int_to_ptr.vmem [resolvable:$true] %s21_s11 }
   0xb   :  { %24 = dma.hbm_to_vmem [thread:$0]  %s20_s7, 128, %s22_s11, [#allocation3]  }
   0xc   :  { %s44_s12 = sshll.u32 %s407_s3, 4  ;;  %s69_s15 = sshll.u32 %s462_s4, 4  ;;  %s45_s12 = int_to_ptr.vmem [resolvable:$true] %s44_s12  ;;  %s70_s15 = int_to_ptr.hbm [resolvable:$true] %s69_s15 }
   0xd   :  { %50 = dma.hbm_to_vmem [thread:$0]  %s43_s9, 2048, %s45_s12, [#allocation6], %s403_s26, %s403_s26, %s404_s27  }
   0xe   :  { %s408_s0 = smov [#allocation10]  }
   0xf   :  { %s71_s16 = sshll.u32 %s408_s0, 4  ;;  %s72_s16 = int_to_ptr.vmem [resolvable:$true] %s71_s16 }
  0x10   :  { %74 = dma.hbm_to_vmem [thread:$0]  %s70_s15, 128, %s72_s16, [#allocation9]  }
  0x11   :  { %394 = dma.done.wait [#allocation3], 128  }
  0x12   :  { %395 = vsyncadd [#allocation3], 4294967168 }
  0x13   :  { %396 = dma.done.wait [#allocation6], 4096  }
  0x14   :  { %397 = vsyncadd [#allocation6], 4294963200 }
  0x15   :  { %398 = dma.done.wait [#allocation9], 2176  }
  0x16   :  { %399 = vsyncadd [#allocation9], 4294965120  ;;  %v114_v0 = vld [vmem:[#allocation5 + $0x78] sm:$0xff]  ;;  %v113_v1 = vld [vmem:[#allocation5 + $0x70] sm:$0xff]  ;;  %s409_s2 = smov [#allocation11]   ;;  %s225_s19 = sshll.u32 %s463_s5, 4  ;;  %s226_s19 = int_to_ptr.hbm [resolvable:$true] %s225_s19 }
  0x17   :  { %116 = vmatpush.msra.mxu0 %v114_v0  ;;  %v112_v2 = vld [vmem:[#allocation5 + $0x68] sm:$0xff]  ;;  %v111_v3 = vld [vmem:[#allocation5 + $0x60] sm:$0xff]  ;;  %v154_v4 = vld [vmem:[#allocation7 + $0x78] sm:$0xff]  ;;  %s223_s4 = sshll.u32 %s409_s2, 4  ;;  %s224_s4 = int_to_ptr.vmem [resolvable:$true] %s223_s4 }
  0x18   :  { %v110_v5 = vld [vmem:[#allocation5 + $0x58] sm:$0xff]  ;;  %156 = vmatpush.msra.mxu1 %v154_v4  ;;  %v153_v6 = vld [vmem:[#allocation7 + $0x70] sm:$0xff]  ;;  %v152_v7 = vld [vmem:[#allocation7 + $0x68] sm:$0xff] }
  0x19   :  { %117 = vmatpush.msra.mxu0 %v113_v1  ;;  %v109_v8 = vld [vmem:[#allocation5 + $0x50] sm:$0xff]  ;;  %v151_v9 = vld [vmem:[#allocation7 + $0x60] sm:$0xff]  ;;  %v108_v10 = vld [vmem:[#allocation5 + $0x48] sm:$0xff] }
  0x1a   :  { %157 = vmatpush.msra.mxu1 %v153_v6  ;;  %v150_v11 = vld [vmem:[#allocation7 + $0x58] sm:$0xff]  ;;  %v107_v12 = vld [vmem:[#allocation5 + $0x40] sm:$0xff]  ;;  %v149_v13 = vld [vmem:[#allocation7 + $0x50] sm:$0xff] }
  0x1b   :  { %118 = vmatpush.msra.mxu0 %v112_v2  ;;  %v106_v14 = vld [vmem:[#allocation5 + $0x38] sm:$0xff]  ;;  %v148_v15 = vld [vmem:[#allocation7 + $0x48] sm:$0xff]  ;;  %v105_v16 = vld [vmem:[#allocation5 + $0x30] sm:$0xff] }
  0x1c   :  { %158 = vmatpush.msra.mxu1 %v152_v7  ;;  %v147_v17 = vld [vmem:[#allocation7 + $0x40] sm:$0xff]  ;;  %v104_v18 = vld [vmem:[#allocation5 + $0x28] sm:$0xff]  ;;  %v146_v19 = vld [vmem:[#allocation7 + $0x38] sm:$0xff] }
  0x1d   :  { %119 = vmatpush.msra.mxu0 %v111_v3  ;;  %v103_v20 = vld [vmem:[#allocation5 + $0x20] sm:$0xff]  ;;  %v145_v21 = vld [vmem:[#allocation7 + $0x30] sm:$0xff]  ;;  %v102_v22 = vld [vmem:[#allocation5 + $0x18] sm:$0xff] }
  0x1e   :  { %159 = vmatpush.msra.mxu1 %v151_v9  ;;  %v144_v23 = vld [vmem:[#allocation7 + $0x28] sm:$0xff]  ;;  %v101_v24 = vld [vmem:[#allocation5 + $0x10] sm:$0xff]  ;;  %v143_v25 = vld [vmem:[#allocation7 + $0x20] sm:$0xff] }
  0x1f   :  { %120 = vmatpush.msra.mxu0 %v110_v5  ;;  %v100_v26 = vld [vmem:[#allocation5 + $0x8] sm:$0xff]  ;;  %v142_v27 = vld [vmem:[#allocation7 + $0x18] sm:$0xff]  ;;  %v99_v28 = vld [vmem:[#allocation5] sm:$0xff] }
  0x20   :  { %160 = vmatpush.msra.mxu1 %v150_v11  ;;  %v98_v29 = vld [vmem:[#allocation2] sm:$0xff]  ;;  %v141_v30 = vld [vmem:[#allocation7 + $0x10] sm:$0xff]  ;;  %v140_v31 = vld [vmem:[#allocation7 + $0x8] sm:$0xff] }
  0x21   :  { %121 = vmatpush.msra.mxu0 %v109_v8  ;;  %v139_v32 = vld [vmem:[#allocation7] sm:$0xff]  ;;  %v194_v33 = vld [vmem:[#allocation8 + $0x78] sm:$0xff]  ;;  %v193_v34 = vld [vmem:[#allocation8 + $0x70] sm:$0xff] }
  0x22   :  { %161 = vmatpush.msra.mxu1 %v149_v13  ;;  %196 = vmatpush.msra.mxu2 %v194_v33  ;;  %v192_v35 = vld [vmem:[#allocation8 + $0x68] sm:$0xff]  ;;  %v191_v36 = vld [vmem:[#allocation8 + $0x60] sm:$0xff]  ;;  %v190_v37 = vld [vmem:[#allocation8 + $0x58] sm:$0xff] }
  0x23   :  { %122 = vmatpush.msra.mxu0 %v108_v10  ;;  %v189_v38 = vld [vmem:[#allocation8 + $0x50] sm:$0xff]  ;;  %v188_v39 = vld [vmem:[#allocation8 + $0x48] sm:$0xff]  ;;  %v187_v40 = vld [vmem:[#allocation8 + $0x40] sm:$0xff] }
  0x24   :  { %162 = vmatpush.msra.mxu1 %v148_v15  ;;  %197 = vmatpush.msra.mxu2 %v193_v34  ;;  %v186_v41 = vld [vmem:[#allocation8 + $0x38] sm:$0xff]  ;;  %v185_v42 = vld [vmem:[#allocation8 + $0x30] sm:$0xff]  ;;  %v184_v43 = vld [vmem:[#allocation8 + $0x28] sm:$0xff] }
  0x25   :  { %123 = vmatpush.msra.mxu0 %v107_v12  ;;  %v183_v44 = vld [vmem:[#allocation8 + $0x20] sm:$0xff]  ;;  %v182_v45 = vld [vmem:[#allocation8 + $0x18] sm:$0xff]  ;;  %v181_v51 = vld [vmem:[#allocation8 + $0x10] sm:$0xff] }
  0x26   :  { %163 = vmatpush.msra.mxu1 %v147_v17  ;;  %198 = vmatpush.msra.mxu2 %v192_v35  ;;  %v245_v46 = vld [vmem:[#allocation10] ss:$0 sm:$0xff]  ;;  %v180_v52 = vld [vmem:[#allocation8 + $0x8] sm:$0xff]  ;;  %v246_v54 = vld [vmem:[#allocation10 + $0x1] ss:$0 sm:$0xff] }
  0x27   :  { %124 = vmatpush.msra.mxu0 %v106_v14  ;;  %v179_v53 = vld [vmem:[#allocation8] sm:$0xff] }
  0x28   :  { %164 = vmatpush.msra.mxu1 %v146_v19  ;;  %199 = vmatpush.msra.mxu2 %v191_v36  ;;  %v247_v59 = vld [vmem:[#allocation10 + $0x2] ss:$0 sm:$0xff] }
  0x29   :  { %125 = vmatpush.msra.mxu0 %v105_v16 }
  0x2a   :  { %165 = vmatpush.msra.mxu1 %v145_v21  ;;  %200 = vmatpush.msra.mxu2 %v190_v37 }
  0x2b   :  { %126 = vmatpush.msra.mxu0 %v104_v18 }
  0x2c   :  { %166 = vmatpush.msra.mxu1 %v144_v23  ;;  %201 = vmatpush.msra.mxu2 %v189_v38 }
  0x2d   :  { %127 = vmatpush.msra.mxu0 %v103_v20 }
  0x2e   :  { %167 = vmatpush.msra.mxu1 %v143_v25  ;;  %202 = vmatpush.msra.mxu2 %v188_v39 }
  0x2f   :  { %128 = vmatpush.msra.mxu0 %v102_v22 }
  0x30   :  { %168 = vmatpush.msra.mxu1 %v142_v27  ;;  %203 = vmatpush.msra.mxu2 %v187_v40 }
  0x31   :  { %129 = vmatpush.msra.mxu0 %v101_v24 }
  0x32   :  { %169 = vmatpush.msra.mxu1 %v141_v30  ;;  %204 = vmatpush.msra.mxu2 %v186_v41 }
  0x33   :  { %130 = vmatpush.msra.mxu0 %v100_v26 }
  0x34   :  { %170 = vmatpush.msra.mxu1 %v140_v31  ;;  %205 = vmatpush.msra.mxu2 %v185_v42 }
  0x35   :  { %131 = vmatpush.msra.mxu0 %v99_v28 }
  0x36   :  { %132 = vmatmul.f32.vlgmr.msra.gmra.mxu0 %v98_v29  ;;  %171 = vmatpush.msra.mxu1 %v139_v32 }
  0x37   :  { %206 = vmatpush.msra.mxu2 %v184_v43 }
  0x39   :  { %207 = vmatpush.msra.mxu2 %v183_v44 }
  0x3b   :  { %208 = vmatpush.msra.mxu2 %v182_v45 }
  0x3d   :  { %209 = vmatpush.msra.mxu2 %v181_v51 }
  0x3f   :  { %210 = vmatpush.msra.mxu2 %v180_v52 }
  0x41   :  { %211 = vmatpush.msra.mxu2 %v179_v53 }
  0xb3   :  { %v133_v47 = vpop.f32.mrf.mxu0 }
  0xb4   :  { %v134_v48 = vadd.f32 %v245_v46, %v133_v47 }
  0xb6   :  { %vm136_vm0 = vcmp.ge.f32.partialorder %v134_v48, 0.0  ;;  %v137_v49 = vmul.f32 0.01, %v134_v48 }
  0xb8   :  { %v138_v50 = vsel %vm136_vm0, %v134_v48, %v137_v49 }
  0xb9   :  { %172 = vmatmul.f32.vlgmr.msra.gmra.mxu1 %v138_v50 }
 0x136   :  { %v173_v55 = vpop.f32.mrf.mxu1 }
 0x137   :  { %v174_v56 = vadd.f32 %v246_v54, %v173_v55 }
 0x139   :  { %vm176_vm1 = vcmp.ge.f32.partialorder %v174_v56, 0.0  ;;  %v177_v57 = vmul.f32 0.01, %v174_v56 }
 0x13b   :  { %v178_v58 = vsel %vm176_vm1, %v174_v56, %v177_v57 }
 0x13c   :  { %212 = vmatmul.f32.vlgmr.msra.gmra.mxu2 %v178_v58 }
 0x1bf   :  { %v213_v60 = vpop.f32.mrf.mxu2 }
 0x1c0   :  { %v214_v61 = vadd.f32 %v247_v59, %v213_v60 }
 0x1c2   :  { %248 = vtanh.f32 %v214_v61 }
 0x1c8   :  { %v249_v62 = vpop.eup %248 }
 0x1c9   :  { %217 = vst [vmem:[#allocation11] sm:$0xff] %v249_v62 }
 0x1ca   :  { %228 = dma.vmem_to_hbm [thread:$0]  %s224_s4, 128, %s226_s19, [#allocation4]  }
 0x1cb   :  { %400 = dma.done.wait [#allocation4], 128  }
 0x1cc   :  { %401 = vsyncadd [#allocation4], 4294967168 }
 0x1cd   :  { %233 = vsyncpa [#allocation3], 1 }
 0x1ce   :  { %234 = vsyncpa [#allocation6], 1 }
 0x1cf   :  { %235 = vsyncpa [#allocation9], 1 }
 0x1d0   :  { %236 = vsyncpa [#allocation4], 1 }

</bundles_post_ra>
